<compile_context>
chip_gen: v6e
topology: v6e:2x2x1
jax: 0.10.0
libtpu: 0.0.40
codegen_flags: <defaults>
</compile_context>

<pallas_src>
import jax
import jax.numpy as jnp
from jax.experimental import pallas as pl
from jax.experimental.pallas import tpu as pltpu

EPS = 1e-5  # nn.LayerNorm default


def prenorm_linear_kernel(x_ref, g_ref, b_ref, w_ref, bias_ref, o_ref):
    # x_ref: (tm, D) block of rows; g/b: (1, D); w: (D, D_out); bias: (1, D_out)
    x = x_ref[...].astype(jnp.float32)

    # LayerNorm over the feature axis (biased variance, like nn.LayerNorm).
    mean = jnp.mean(x, axis=-1, keepdims=True)
    centered = x - mean
    var = jnp.mean(centered * centered, axis=-1, keepdims=True)
    xn = centered * jax.lax.rsqrt(var + EPS)
    y = xn * g_ref[...].astype(jnp.float32) + b_ref[...].astype(jnp.float32)

    # fn = Linear(dim -> dim): feed the MXU in the weight's NATIVE dtype
    # (bf16 weights are not upcast -- full bf16 MXU throughput on v6e/v7x and
    # half the weight VMEM footprint); accumulate in f32.
    out = jnp.dot(y.astype(w_ref.dtype), w_ref[...],
                  preferred_element_type=jnp.float32)
    out = out + bias_ref[...].astype(jnp.float32)
    o_ref[...] = out.astype(o_ref.dtype)


def prenorm_linear(x, gamma, beta, w, bias, *, tm=256):
    """x: (B, S, D), gamma/beta: (D,), w: (D, D_out), bias: (D_out,).

    Row tile `tm` defaults to 256 (256-cadence for the v6e/v7x MXU and a
    128-multiple for v5e); it is clamped down for tiny inputs and the row
    count is padded up to a tile multiple instead of asserting divisibility.
    Feature axes D / D_out are full-extent blocks; for best performance they
    should be multiples of 128 (lane-dense loads/stores).
    """
    B, S, D = x.shape
    D_out = w.shape[1]
    N = B * S

    # Clamp the row tile for small inputs (keep a multiple of 8), then pad the
    # row count up to a multiple of the tile (padded rows are discarded).
    tm = max(8, min(tm, ((N + 7) // 8) * 8))
    grid_m = pl.cdiv(N, tm)
    N_pad = grid_m * tm

    x2 = x.reshape(N, D)
    if N_pad != N:
        x2 = jnp.pad(x2, ((0, N_pad - N), (0, 0)))

    g2 = gamma.reshape(1, D)
    b2 = beta.reshape(1, D)
    bias2 = bias.reshape(1, D_out)

    # Explicit VMEM budget: double-buffered x/out tiles + resident weight,
    # clamped so we never ask for more than v7x's 64 MiB physical VMEM.
    # NOTE: for very large D * D_out the weight itself should be tiled over
    # K/N with an f32 accumulator scratch; not needed at these sizes.
    x_b = jnp.dtype(x.dtype).itemsize
    w_b = jnp.dtype(w.dtype).itemsize
    vmem_need = (2 * tm * D * x_b                 # x tiles
                 + 2 * tm * D_out * x_b           # out tiles
                 + 2 * D * D_out * w_b            # weight (double-buffered)
                 + 2 * (2 * D + D_out) * 4        # gamma / beta / bias
                 + 8 * tm * max(D, D_out) * 4)    # f32 temporaries headroom
    vmem_limit = int(min(max(vmem_need, 8 << 20), 64 << 20))

    # Advisory cost estimate so XLA schedules the custom call sensibly.
    cost = pl.CostEstimate(
        flops=2 * N_pad * D * D_out + 8 * N_pad * D,
        transcendentals=N_pad,  # one rsqrt per row
        bytes_accessed=(N_pad * D * x_b + D * D_out * w_b
                        + N_pad * D_out * x_b + (2 * D + D_out) * 4),
    )

    out2 = pl.pallas_call(
        prenorm_linear_kernel,
        out_shape=jax.ShapeDtypeStruct((N_pad, D_out), x.dtype),
        grid_spec=pltpu.PrefetchScalarGridSpec(
            num_scalar_prefetch=0,
            grid=(grid_m,),
            in_specs=[
                pl.BlockSpec((tm, D), lambda i: (i, 0)),      # x rows
                pl.BlockSpec((1, D), lambda i: (0, 0)),       # gamma
                pl.BlockSpec((1, D), lambda i: (0, 0)),       # beta
                pl.BlockSpec((D, D_out), lambda i: (0, 0)),   # fn weight
                pl.BlockSpec((1, D_out), lambda i: (0, 0)),   # fn bias
            ],
            out_specs=pl.BlockSpec((tm, D_out), lambda i: (i, 0)),
        ),
        compiler_params=pltpu.CompilerParams(
            dimension_semantics=("parallel",),
            vmem_limit_bytes=vmem_limit,
        ),
        cost_estimate=cost,
    )(x2, g2, b2, w, bias2)

    return out2[:N].reshape(B, S, D_out)


if __name__ == "__main__":
    # Small but lane-dense shapes: D a multiple of 128 so stores are unmasked.
    B, S, D = 2, 8, 128

    key = jax.random.PRNGKey(0)
    kx, kw, kb = jax.random.split(key, 3)

    x = jax.random.normal(kx, (B, S, D), dtype=jnp.float32)

    # LayerNorm params (nn.LayerNorm default init: weight=1, bias=0).
    gamma = jnp.ones((D,), dtype=jnp.float32)
    beta = jnp.zeros((D,), dtype=jnp.float32)

    # fn = Linear(D, D), deterministic init (stored as (in, out)).
    w = jax.random.normal(kw, (D, D), dtype=jnp.float32) * (1.0 / jnp.sqrt(D))
    bias = jax.random.normal(kb, (D,), dtype=jnp.float32) * 0.01

    out = prenorm_linear(x, gamma, beta, w, bias)
    jax.block_until_ready(out)

    # Reference in plain JAX.  Tolerance covers TPU default (bf16-pass) matmul
    # precision used by both the kernel and the reference dot.
    mean = jnp.mean(x, axis=-1, keepdims=True)
    var = jnp.mean((x - mean) ** 2, axis=-1, keepdims=True)
    xn = (x - mean) / jnp.sqrt(var + EPS)
    ref = (xn * gamma + beta) @ w + bias
    assert out.shape == ref.shape
    assert jnp.allclose(out, ref, atol=2e-2, rtol=2e-2), "mismatch vs reference"

    print("KERNEL_OK")
</pallas_src>

<mosaic_0001>
module attributes {stable_mosaic.version = 11 : i64} {
  func.func @prenorm_linear_kernel(%arg0: i32, %arg1: memref<16x128xf32, #tpu.memory_space<vmem>>, %arg2: memref<1x128xf32, #tpu.memory_space<vmem>>, %arg3: memref<1x128xf32, #tpu.memory_space<vmem>>, %arg4: memref<128x128xf32, #tpu.memory_space<vmem>>, %arg5: memref<1x128xf32, #tpu.memory_space<vmem>>, %arg6: memref<16x128xf32, #tpu.memory_space<vmem>>) attributes {dimension_semantics = [#tpu.dimension_semantics<parallel>], iteration_bounds = array<i64: 1>, scalar_prefetch = 0 : i64, scratch_operands = 0 : i64, tpu.core_type = #tpu.core_type<tc>, window_params = [{transform_indices = @transform_0, window_bounds = array<i64: 16, 128>}, {pipeline_mode = #tpu.pipeline_mode<synchronous>, transform_indices = @transform_1, window_bounds = array<i64: 1, 128>}, {pipeline_mode = #tpu.pipeline_mode<synchronous>, transform_indices = @transform_2, window_bounds = array<i64: 1, 128>}, {pipeline_mode = #tpu.pipeline_mode<synchronous>, transform_indices = @transform_3, window_bounds = array<i64: 128, 128>}, {pipeline_mode = #tpu.pipeline_mode<synchronous>, transform_indices = @transform_4, window_bounds = array<i64: 1, 128>}, {transform_indices = @transform_5, window_bounds = array<i64: 16, 128>}]} {
    %c0 = arith.constant 0 : index
    %c0_0 = arith.constant 0 : index
    %0 = vector.load %arg1[%c0, %c0_0] : memref<16x128xf32, #tpu.memory_space<vmem>>, vector<16x128xf32>
    %cst = arith.constant dense<0.000000e+00> : vector<16xf32>
    %1 = vector.multi_reduction <add>, %0, %cst [1] : vector<16x128xf32> to vector<16xf32>
    %2 = vector.shape_cast %1 : vector<16xf32> to vector<16x1xf32>
    %cst_1 = arith.constant 1.280000e+02 : f32
    %3 = vector.broadcast %cst_1 : f32 to vector<16x1xf32>
    %4 = arith.divf %2, %3 : vector<16x1xf32>
    %5 = vector.broadcast %4 : vector<16x1xf32> to vector<16x128xf32>
    %6 = arith.subf %0, %5 : vector<16x128xf32>
    %7 = arith.mulf %6, %6 : vector<16x128xf32>
    %cst_2 = arith.constant dense<0.000000e+00> : vector<16xf32>
    %8 = vector.multi_reduction <add>, %7, %cst_2 [1] : vector<16x128xf32> to vector<16xf32>
    %9 = vector.shape_cast %8 : vector<16xf32> to vector<16x1xf32>
    %cst_3 = arith.constant 1.280000e+02 : f32
    %10 = vector.broadcast %cst_3 : f32 to vector<16x1xf32>
    %11 = arith.divf %9, %10 : vector<16x1xf32>
    %cst_4 = arith.constant 9.99999974E-6 : f32
    %12 = vector.broadcast %cst_4 : f32 to vector<16x1xf32>
    %13 = arith.addf %11, %12 : vector<16x1xf32>
    %14 = math.rsqrt %13 : vector<16x1xf32>
    %15 = vector.broadcast %14 : vector<16x1xf32> to vector<16x128xf32>
    %16 = arith.mulf %6, %15 : vector<16x128xf32>
    %c0_5 = arith.constant 0 : index
    %c0_6 = arith.constant 0 : index
    %17 = vector.load %arg2[%c0_5, %c0_6] : memref<1x128xf32, #tpu.memory_space<vmem>>, vector<1x128xf32>
    %18 = vector.broadcast %17 : vector<1x128xf32> to vector<16x128xf32>
    %19 = arith.mulf %16, %18 : vector<16x128xf32>
    %c0_7 = arith.constant 0 : index
    %c0_8 = arith.constant 0 : index
    %20 = vector.load %arg3[%c0_7, %c0_8] : memref<1x128xf32, #tpu.memory_space<vmem>>, vector<1x128xf32>
    %21 = vector.broadcast %20 : vector<1x128xf32> to vector<16x128xf32>
    %22 = arith.addf %19, %21 : vector<16x128xf32>
    %c0_9 = arith.constant 0 : index
    %c0_10 = arith.constant 0 : index
    %23 = vector.load %arg4[%c0_9, %c0_10] : memref<128x128xf32, #tpu.memory_space<vmem>>, vector<128x128xf32>
    %cst_11 = arith.constant dense<0.000000e+00> : vector<16x128xf32>
    %24 = tpu.matmul %22, %23, %cst_11 {dimension_numbers = #tpu.dot_dimension_numbers<[1], [0], [0], [1], [0, 0, 1, 1], [], []>} : vector<16x128xf32>, vector<128x128xf32>, vector<16x128xf32> -> vector<16x128xf32>
    %c0_12 = arith.constant 0 : index
    %c0_13 = arith.constant 0 : index
    %25 = vector.load %arg5[%c0_12, %c0_13] : memref<1x128xf32, #tpu.memory_space<vmem>>, vector<1x128xf32>
    %26 = vector.broadcast %25 : vector<1x128xf32> to vector<16x128xf32>
    %27 = arith.addf %24, %26 : vector<16x128xf32>
    %c0_14 = arith.constant 0 : index
    %c0_15 = arith.constant 0 : index
    %28 = vector.load %arg6[%c0_14, %c0_15] : memref<16x128xf32, #tpu.memory_space<vmem>>, vector<16x128xf32>
    tpu.vector_store %arg6[%c0_14, %c0_15], %27 {strides = array<i32>} : memref<16x128xf32, #tpu.memory_space<vmem>>, vector<16x128xf32>,
    return
  }
  func.func @transform_0(%arg0: i32) -> (i32, i32) {
    %c0_i32 = arith.constant 0 : i32
    %c0_i32_0 = arith.constant 0 : i32
    return %arg0, %c0_i32 : i32, i32
  }
  func.func @transform_1(%arg0: i32) -> (i32, i32) {
    %c0_i32 = arith.constant 0 : i32
    %c0_i32_0 = arith.constant 0 : i32
    %c0_i32_1 = arith.constant 0 : i32
    return %c0_i32, %c0_i32_0 : i32, i32
  }
  func.func @transform_2(%arg0: i32) -> (i32, i32) {
    %c0_i32 = arith.constant 0 : i32
    %c0_i32_0 = arith.constant 0 : i32
    %c0_i32_1 = arith.constant 0 : i32
    return %c0_i32, %c0_i32_0 : i32, i32
  }
  func.func @transform_3(%arg0: i32) -> (i32, i32) {
    %c0_i32 = arith.constant 0 : i32
    %c0_i32_0 = arith.constant 0 : i32
    %c0_i32_1 = arith.constant 0 : i32
    return %c0_i32, %c0_i32_0 : i32, i32
  }
  func.func @transform_4(%arg0: i32) -> (i32, i32) {
    %c0_i32 = arith.constant 0 : i32
    %c0_i32_0 = arith.constant 0 : i32
    %c0_i32_1 = arith.constant 0 : i32
    return %c0_i32, %c0_i32_0 : i32, i32
  }
  func.func @transform_5(%arg0: i32) -> (i32, i32) {
    %c0_i32 = arith.constant 0 : i32
    %c0_i32_0 = arith.constant 0 : i32
    return %arg0, %c0_i32 : i32, i32
  }
}

</mosaic_0001>

<bundles_post_ra>
// kernel: tpu_custom_call.1
= control target key start
LH: loop header
LB: loop body
LE: loop exit
PB: predicated region body
PF: predicated region fallthrough
CT: control target
= control target key end

     0   :  { %10 = vsyncpa [#allocation3], 0  ;;  %s403_s0 = inlined_call_operand.hbm [shape: f32[16,128], index: 0, kind: input, shape index: {}]   ;;  %s404_s1 = inlined_call_operand.vmem [shape: f32[1,128], index: 1, kind: input, shape index: {}]   ;;  %s405_s2 = inlined_call_operand.vmem [shape: f32[1,128], index: 2, kind: input, shape index: {}]   ;;  %s406_s3 = inlined_call_operand.hbm [shape: f32[128,128], index: 3, kind: input, shape index: {}]   ;;  %s407_s4 = inlined_call_operand.vmem [shape: f32[1,128], index: 4, kind: input, shape index: {}]   ;;  %s408_s5 = inlined_call_operand.hbm [shape: f32[16,128], index: 5, kind: output, shape index: {}]  }
   0x1   :  { %11 = vsyncpa [#allocation6], 0 }
   0x2   :  { %12 = vsyncpa [#allocation4], 0  ;;  %s341_s18 = smov [#allocation2]  }
   0x3   :  { %s18_s19 = sshll.u32 %s341_s18, 4  ;;  %s19_s19 = int_to_ptr.vmem [resolvable:$true] %s18_s19 }
   0x4   :  { %s283_s20 = scalar_lea.vmem %s19_s19, 256  ;;  %p288_p1 = scmp.lt.s32.totalorder %s19_s19, %s19_s19 }
   0x5   :  { %p284_p0 = scmp.ne.s32.totalorder %s19_s19, %s283_s20  ;;  %p289_p2 = scmp.lt.s32.totalorder %s283_s20, %s283_s20 }
   0x7   :  { %p290_p3 = por %p289_p2, %p288_p1 }
   0x9   :  { %p291_p4 = pnand %p290_p3, %p284_p0 }
   0xb   :  { %294 = shalt.err (!%p291_p4)
}
   0xc   :  { %s342_s21 = smov 128   ;;  %s343_s22 = smov 8  }
   0xd   :  { %24 = dma.hbm_to_vmem [thread:$0]  %s403_s0, 256, %s19_s19, [#allocation3], %s342_s21, %s342_s21, %s343_s22  }
   0xe   :  { %s344_s25 = smov [#allocation5]  }
   0xf   :  { %s34_s26 = sshll.u32 %s344_s25, 4  ;;  %s35_s26 = int_to_ptr.vmem [resolvable:$true] %s34_s26 }
  0x10   :  { %s303_s27 = scalar_lea.vmem %s35_s26, 2048  ;;  %p308_p6 = scmp.lt.s32.totalorder %s35_s26, %s35_s26 }
  0x11   :  { %p304_p5 = scmp.ne.s32.totalorder %s35_s26, %s303_s27  ;;  %p309_p7 = scmp.lt.s32.totalorder %s303_s27, %s303_s27 }
  0x13   :  { %p310_p8 = por %p309_p7, %p308_p6 }
  0x15   :  { %p311_p9 = pnand %p310_p8, %p304_p5 }
  0x17   :  { %314 = shalt.err (!%p311_p9)
}
  0x18   :  { %40 = dma.hbm_to_vmem [thread:$0]  %s406_s3, 2048, %s35_s26, [#allocation6], %s342_s21, %s342_s21, %s343_s22  }
  0x19   :  { %335 = dma.done.wait [#allocation3], 256  }
  0x1a   :  { %336 = vsyncadd [#allocation3], 4294967040 }
  0x1b   :  { %337 = dma.done.wait [#allocation6], 2048  }
  0x1c   :  { %338 = vsyncadd [#allocation6], 4294965248  ;;  %v49_v0 = vld [vmem:[#allocation2] sm:$0xff]  ;;  %v50_v1 = vld [vmem:[#allocation2 + $0x8] sm:$0xff]  ;;  %s345_s9 = smov [#allocation7]  }
  0x1d   :  { %51 = vadd.xlane.f32.xlu0 %v49_v0  ;;  %v107_v2 = vld [vmem:[#allocation5 + $0x78] sm:$0xff]  ;;  %v106_v3 = vld [vmem:[#allocation5 + $0x70] sm:$0xff]  ;;  %v105_v12 = vld [vmem:[#allocation5 + $0x68] sm:$0xff] }
  0x1e   :  { %231 = vmatprep.subr.mxu0 %v107_v2  ;;  %v104_v13 = vld [vmem:[#allocation5 + $0x60] sm:$0xff]  ;;  %v103_v14 = vld [vmem:[#allocation5 + $0x58] sm:$0xff]  ;;  %v102_v15 = vld [vmem:[#allocation5 + $0x50] sm:$0xff] }
  0x1f   :  { %232 = vmatpush3.msra.mxu0 %v107_v2  ;;  %v101_v16 = vld [vmem:[#allocation5 + $0x48] sm:$0xff]  ;;  %v100_v17 = vld [vmem:[#allocation5 + $0x40] sm:$0xff]  ;;  %v99_v18 = vld [vmem:[#allocation5 + $0x38] sm:$0xff] }
  0x20   :  { %233 = vmatprep.subr.mxu0 %v106_v3  ;;  %v98_v19 = vld [vmem:[#allocation5 + $0x30] sm:$0xff]  ;;  %v97_v20 = vld [vmem:[#allocation5 + $0x28] sm:$0xff]  ;;  %v96_v21 = vld [vmem:[#allocation5 + $0x20] sm:$0xff] }
  0x21   :  { %53 = vadd.xlane.f32.xlu0 %v50_v1  ;;  %234 = vmatpush3.msra.mxu0 %v106_v3  ;;  %v95_v22 = vld [vmem:[#allocation5 + $0x18] sm:$0xff]  ;;  %v94_v23 = vld [vmem:[#allocation5 + $0x10] sm:$0xff]  ;;  %v93_v24 = vld [vmem:[#allocation5 + $0x8] sm:$0xff] }
  0x22   :  { %235 = vmatprep.subr.mxu0 %v105_v12  ;;  %v92_v25 = vld [vmem:[#allocation5] sm:$0xff]  ;;  %v210_v33 = vld [vmem:[%s404_s1] ss:$0 sm:$0xff]  ;;  %s197_s1 = sshll.u32 %s345_s9, 4  ;;  %s198_s1 = int_to_ptr.vmem [resolvable:$true] %s197_s1 }
  0x23   :  { %236 = vmatpush3.msra.mxu0 %v105_v12  ;;  %v211_v35 = vld [vmem:[%s405_s2] ss:$0 sm:$0xff]  ;;  %s315_s2 = scalar_lea.vmem %s198_s1, 256  ;;  %p320_p11 = scmp.lt.s32.totalorder %s198_s1, %s198_s1 }
  0x24   :  { %237 = vmatprep.subr.mxu0 %v104_v13  ;;  %v212_v42 = vld [vmem:[%s407_s4] ss:$0 sm:$0xff]  ;;  %p316_p10 = scmp.ne.s32.totalorder %s198_s1, %s315_s2  ;;  %p321_p12 = scmp.lt.s32.totalorder %s315_s2, %s315_s2 }
  0x25   :  { %238 = vmatpush3.msra.mxu0 %v104_v13 }
  0x26   :  { %239 = vmatprep.subr.mxu0 %v103_v14  ;;  %p322_p13 = por %p321_p12, %p320_p11 }
  0x27   :  { %240 = vmatpush3.msra.mxu0 %v103_v14 }
  0x28   :  { %241 = vmatprep.subr.mxu0 %v102_v15  ;;  %p323_p0 = pnand %p322_p13, %p316_p10 }
  0x29   :  { %242 = vmatpush3.msra.mxu0 %v102_v15 }
  0x2a   :  { %243 = vmatprep.subr.mxu0 %v101_v16 }
  0x2b   :  { %244 = vmatpush3.msra.mxu0 %v101_v16 }
  0x2c   :  { %245 = vmatprep.subr.mxu0 %v100_v17 }
  0x2d   :  { %246 = vmatpush3.msra.mxu0 %v100_v17 }
  0x2e   :  { %247 = vmatprep.subr.mxu0 %v99_v18 }
  0x2f   :  { %248 = vmatpush3.msra.mxu0 %v99_v18 }
  0x30   :  { %249 = vmatprep.subr.mxu0 %v98_v19 }
  0x31   :  { %250 = vmatpush3.msra.mxu0 %v98_v19 }
  0x32   :  { %251 = vmatprep.subr.mxu0 %v97_v20 }
  0x33   :  { %252 = vmatpush3.msra.mxu0 %v97_v20 }
  0x34   :  { %253 = vmatprep.subr.mxu0 %v96_v21 }
  0x35   :  { %254 = vmatpush3.msra.mxu0 %v96_v21 }
  0x36   :  { %255 = vmatprep.subr.mxu0 %v95_v22 }
  0x37   :  { %256 = vmatpush3.msra.mxu0 %v95_v22 }
  0x38   :  { %257 = vmatprep.subr.mxu0 %v94_v23 }
  0x39   :  { %258 = vmatpush3.msra.mxu0 %v94_v23 }
  0x3a   :  { %259 = vmatprep.subr.mxu0 %v93_v24 }
  0x3b   :  { %260 = vmatpush3.msra.mxu0 %v93_v24 }
  0x3c   :  { %261 = vmatprep.subr.mxu0 %v92_v25 }
  0x3d   :  { %262 = vmatpush3.msra.mxu0 %v92_v25 }
  0xa6   :  { %v52_v4 = vpop.xlane.xlu0 %51 }
  0xa7   :  { %v56_v5 = vmul.f32 0.0078125, %v52_v4 }
  0xa9   :  { %v58_v6 = vsub.f32 %v49_v0, %v56_v5 }
  0xaa   :  { %v54_v7 = vpop.xlane.xlu0 %53 }
  0xab   :  { %v57_v8 = vmul.f32 0.0078125, %v54_v7  ;;  %v60_v9 = vmul.f32 %v58_v6, %v58_v6 }
  0xad   :  { %v59_v10 = vsub.f32 %v50_v1, %v57_v8  ;;  %62 = vadd.xlane.f32.xlu1 %v60_v9 }
  0xaf   :  { %v61_v11 = vmul.f32 %v59_v10, %v59_v10 }
  0xb1   :  { %64 = vadd.xlane.f32.xlu1 %v61_v11 }
 0x136   :  { %v63_v26 = vpop.xlane.xlu1 %62 }
 0x137   :  { %v66_v27 = vmul.f32 0.0078125, %v63_v26 }
 0x139   :  { %v68_v28 = vadd.f32 1e-05, %v66_v27 }
 0x13a   :  { %v65_v29 = vpop.xlane.xlu1 %64 }
 0x13b   :  { %271 = vrsqrt.f32 %v68_v28  ;;  %v67_v30 = vmul.f32 0.0078125, %v65_v29 }
 0x13d   :  { %v69_v31 = vadd.f32 1e-05, %v67_v30 }
 0x13f   :  { %273 = vrsqrt.f32 %v69_v31 }
 0x148   :  { %v272_v32 = vpop.eup %271 }
 0x149   :  { %v72_v34 = vmul.f32 %v272_v32, %v58_v6 }
 0x14b   :  { %v81_v36 = vmul.f32 %v210_v33, %v72_v34 }
 0x14c   :  { %v274_v37 = vpop.eup %273 }
 0x14d   :  { %v73_v38 = vmul.f32 %v274_v37, %v59_v10  ;;  %v90_v39 = vadd.f32 %v211_v35, %v81_v36 }
 0x14f   :  { %v82_v40 = vmul.f32 %v210_v33, %v73_v38  ;;  %263 = vmatprep.mubr.f32.mxu0 %v90_v39 }
 0x151   :  { %v91_v41 = vadd.f32 %v211_v35, %v82_v40 }
 0x153   :  { %264 = vmatmul.mubr.f32.vlgmr.msra.gmra.mxu0 %v91_v41 }
 0x213   :  { %v265_v43 = vpop.f32.mrf.mxu0 }
 0x214   :  { %v187_v44 = vadd.f32 %v265_v43, %v212_v42 }
 0x215   :  { %v181_v45 = vpop.f32.mrf.mxu0 }
 0x216   :  { %191 = vst [vmem:[#allocation7 + $0x8] sm:$0xff] %v187_v44  ;;  %v182_v46 = vadd.f32 %v212_v42, %v181_v45 }
 0x218   :  { %190 = vst [vmem:[#allocation7] sm:$0xff] %v182_v46 }
 0x219   :  { %326 = shalt.err (!%p323_p0)
}
 0x21a   :  { %203 = dma.vmem_to_hbm [thread:$0]  %s198_s1, 256, %s408_s5, [#allocation4], %s342_s21, %s342_s21, %s343_s22  }
 0x21b   :  { %339 = dma.done.wait [#allocation4], 256  }
 0x21c   :  { %340 = vsyncadd [#allocation4], 4294967040 }
 0x21d   :  { %207 = vsyncpa [#allocation3], 1 }
 0x21e   :  { %208 = vsyncpa [#allocation6], 1 }
 0x21f   :  { %209 = vsyncpa [#allocation4], 1 }

</bundles_post_ra>
